<compile_context>
chip_gen: v6e
topology: v6e:2x2x1
jax: 0.10.0
libtpu: 0.0.40
codegen_flags: <defaults>
</compile_context>

<pallas_src>
import numpy as np
import jax
import jax.numpy as jnp
from jax.experimental import pallas as pl
from jax.experimental.pallas import tpu as pltpu


def _bilinear_x2_matrix(size_in: int) -> np.ndarray:
    """Interpolation matrix U (2*size_in, size_in) for scale-2 bilinear,
    align_corners=False (PyTorch semantics: src = (dst+0.5)/2 - 0.5, clamp<0)."""
    size_out = 2 * size_in
    U = np.zeros((size_out, size_in), dtype=np.float32)
    for i in range(size_out):
        src = max((i + 0.5) * 0.5 - 0.5, 0.0)
        i0 = min(int(np.floor(src)), size_in - 1)
        i1 = min(i0 + 1, size_in - 1)
        w1 = src - i0
        U[i, i0] += 1.0 - w1
        U[i, i1] += w1
    return U


def _default_num_col_blocks() -> int:
    """2 output-column blocks only where 2 TensorCores exist (v7x);
    single grid step on 1-TC chips (v5e/v6e) to avoid per-step overhead."""
    try:
        kind = jax.devices()[0].device_kind.lower()
    except Exception:
        return 1
    return 2 if "v7" in kind else 1


def _make_kernel(mm_dtype):
    def kernel(wbd_ref, x_ref, kt_ref, y_ref, o_ref):
        # ---- 1x1 conv FIRST (linear ops commute), one small MXU dot -------
        # z[r, p] = sum_k W_bd[r, k] * x2[k, p]   -> (N*C_out, H*W), f32.
        z = jnp.dot(wbd_ref[...], x_ref[...],
                    preferred_element_type=jnp.float32)

        # ---- fused scale-2 bilinear upsample: one lane-dense MXU matmul ---
        # K = kron(Uh, Uw); out_flat = z_flat @ K^T (this column block).
        up = jnp.dot(z.astype(mm_dtype), kt_ref[...],
                     preferred_element_type=jnp.float32)  # (N*C_out, TC) f32

        # ---- fused skip add + lane-dense store ----------------------------
        o_ref[...] = (up + y_ref[...]).astype(o_ref.dtype)

    return kernel


def skip_upsample_forward(x, w_conv, y, *, num_col_blocks=None,
                          mm_dtype=jnp.bfloat16):
    """SkipUpSample forward: conv1x1(bilinear_x2(x)) + y.

    x: (N, C_in, H, W), w_conv: (C_out, C_in), y: (N, C_out, 2H, 2W)
    returns (N, C_out, 2H, 2W).
    """
    N, C_in, H, W = x.shape
    C_out = w_conv.shape[0]
    H2, W2 = 2 * H, 2 * W
    P, Q = H * W, H2 * W2
    M = N * C_out
    K = N * C_in

    if num_col_blocks is None:
        num_col_blocks = _default_num_col_blocks()

    # Fused interpolation operator K^T = kron(Uh, Uw)^T : (H*W, 4*H*W).
    # Entries (products of {0, .25, .5, .75, 1}) are exact in bf16.
    uh = _bilinear_x2_matrix(H)                               # (2H, H)
    uw = _bilinear_x2_matrix(W)                               # (2W, W)
    kt = jnp.asarray(np.kron(uh, uw).T, dtype=mm_dtype)       # (P, Q)

    # Block-diagonal conv weight so the fused batch stays one 2-D slab (f32).
    wbd = jnp.kron(jnp.eye(N, dtype=jnp.float32),
                   w_conv.astype(jnp.float32))                # (M, K)

    # Lane-dense slabs (free metadata reshapes, done outside the kernel).
    x2 = x.reshape(K, P)                                      # (N*C_in, H*W)
    y2 = y.reshape(M, Q)                                      # (N*C_out, 4*H*W)

    # Column-block grid over the output (keeps blocks lane-multiples of 128).
    if Q % (num_col_blocks * 128) == 0:
        block_cols = Q // num_col_blocks
    else:
        block_cols = Q

    # VMEM-scaling guard: the (P, block_cols) K^T tile is double-buffered and
    # grows as 4*(H*W)^2; shrink block_cols (keeping a 128-lane multiple)
    # before it approaches the scoped budget (v7x physical VMEM is 64 MiB).
    mm_bytes = jnp.dtype(mm_dtype).itemsize
    kt_budget = 24 << 20
    while (2 * P * block_cols * mm_bytes > kt_budget) and (block_cols % 256 == 0):
        block_cols //= 2
    nb = Q // block_cols

    # Explicit VMEM limit: double-buffered tiles + small slack.
    tile_bytes = (wbd.size * 4 + x2.size * 4
                  + P * block_cols * mm_bytes          # K^T tile
                  + 2 * M * block_cols * 4)            # y tile + out tile
    vmem_limit = int(min(max(2 * tile_bytes + (2 << 20), 8 << 20), 96 << 20))

    # Advisory cost estimate (dominant bytes: the dense K^T constant).
    cost = pl.CostEstimate(
        flops=2 * M * P * Q + 2 * M * K * P,
        transcendentals=0,
        bytes_accessed=int(kt.size * mm_bytes + (x2.size + y2.size
                                                 + M * Q + wbd.size) * 4),
    )

    kernel = _make_kernel(mm_dtype)

    out_flat = pl.pallas_call(
        kernel,
        out_shape=jax.ShapeDtypeStruct((M, Q), x.dtype),
        grid=(nb,),
        in_specs=[
            pl.BlockSpec((M, K), lambda j: (0, 0)),            # W_bd (f32)
            pl.BlockSpec((K, P), lambda j: (0, 0)),            # x slab (f32)
            pl.BlockSpec((P, block_cols), lambda j: (0, j)),   # K^T cols
            pl.BlockSpec((M, block_cols), lambda j: (0, j)),   # y cols
        ],
        out_specs=pl.BlockSpec((M, block_cols), lambda j: (0, j)),
        compiler_params=pltpu.CompilerParams(
            dimension_semantics=("parallel",),
            vmem_limit_bytes=vmem_limit),
        cost_estimate=cost,
    )(wbd, x2, kt, y2)

    return out_flat.reshape(N, C_out, H2, W2)


if __name__ == "__main__":
    # SkipUpSample(in_channels=4, s_factor=4) from the Decoder:
    #   conv input channels = in_channels + s_factor = 8, output channels = 4
    in_channels, s_factor = 4, 4
    C_in = in_channels + s_factor
    C_out = in_channels
    N, H, W = 2, 16, 16
    H2, W2 = 2 * H, 2 * W

    key = jax.random.PRNGKey(0)
    kx, kw, ky = jax.random.split(key, 3)
    x = jax.random.normal(kx, (N, C_in, H, W), dtype=jnp.float32)
    w_conv = jax.random.normal(kw, (C_out, C_in), dtype=jnp.float32) * 0.1
    y = jax.random.normal(ky, (N, C_out, H2, W2), dtype=jnp.float32)

    # pure-JAX reference: bilinear x2 (align_corners=False) -> 1x1 conv -> + y
    uh = jnp.asarray(_bilinear_x2_matrix(H))
    uw = jnp.asarray(_bilinear_x2_matrix(W))
    ref = jnp.einsum("oc,ph,nchw,qw->nopq", w_conv, uh, x, uw) + y

    # Default path: bf16 K^T / activation operand (fast on v5e/v6e/v7x MXU),
    # f32 accumulation.  K is exact in bf16; the activation cast costs ~3
    # decimal digits, hence the looser tolerance.
    out = jax.block_until_ready(skip_upsample_forward(x, w_conv, y))
    assert out.shape == (N, C_out, H2, W2), out.shape
    assert jnp.allclose(out, ref, atol=3e-2, rtol=3e-2)

    # f32 matmul operands: tight-tolerance correctness check of the same path.
    out_f32 = jax.block_until_ready(
        skip_upsample_forward(x, w_conv, y, mm_dtype=jnp.float32))
    assert jnp.allclose(out_f32, ref, atol=1e-4, rtol=1e-4)

    print("KERNEL_OK")
</pallas_src>

<mosaic_0001>
module attributes {stable_mosaic.version = 11 : i64} {
  func.func @kernel(%arg0: i32, %arg1: memref<8x16xf32, #tpu.memory_space<vmem>>, %arg2: memref<16x256xf32, #tpu.memory_space<vmem>>, %arg3: memref<256x1024xbf16, #tpu.memory_space<vmem>>, %arg4: memref<8x1024xf32, #tpu.memory_space<vmem>>, %arg5: memref<8x1024xf32, #tpu.memory_space<vmem>>) attributes {dimension_semantics = [#tpu.dimension_semantics<parallel>], iteration_bounds = array<i64: 1>, scalar_prefetch = 0 : i64, scratch_operands = 0 : i64, tpu.core_type = #tpu.core_type<tc>, window_params = [{pipeline_mode = #tpu.pipeline_mode<synchronous>, transform_indices = @transform_0, window_bounds = array<i64: 8, 16>}, {pipeline_mode = #tpu.pipeline_mode<synchronous>, transform_indices = @transform_1, window_bounds = array<i64: 16, 256>}, {transform_indices = @transform_2, window_bounds = array<i64: 256, 1024>}, {transform_indices = @transform_3, window_bounds = array<i64: 8, 1024>}, {transform_indices = @transform_4, window_bounds = array<i64: 8, 1024>}]} {
    %c0 = arith.constant 0 : index
    %c0_0 = arith.constant 0 : index
    %0 = vector.load %arg1[%c0, %c0_0] : memref<8x16xf32, #tpu.memory_space<vmem>>, vector<8x16xf32>
    %c0_1 = arith.constant 0 : index
    %c0_2 = arith.constant 0 : index
    %1 = vector.load %arg2[%c0_1, %c0_2] : memref<16x256xf32, #tpu.memory_space<vmem>>, vector<16x256xf32>
    %cst = arith.constant dense<0.000000e+00> : vector<8x256xf32>
    %2 = tpu.matmul %0, %1, %cst {dimension_numbers = #tpu.dot_dimension_numbers<[1], [0], [0], [1], [0, 0, 1, 1], [], []>} : vector<8x16xf32>, vector<16x256xf32>, vector<8x256xf32> -> vector<8x256xf32>
    %3 = arith.truncf %2 : vector<8x256xf32> to vector<8x256xbf16>
    %c0_3 = arith.constant 0 : index
    %c0_4 = arith.constant 0 : index
    %4 = vector.load %arg3[%c0_3, %c0_4] : memref<256x1024xbf16, #tpu.memory_space<vmem>>, vector<256x1024xbf16>
    %cst_5 = arith.constant dense<0.000000e+00> : vector<8x1024xf32>
    %5 = tpu.matmul %3, %4, %cst_5 {dimension_numbers = #tpu.dot_dimension_numbers<[1], [0], [0], [1], [0, 0, 1, 1], [], []>} : vector<8x256xbf16>, vector<256x1024xbf16>, vector<8x1024xf32> -> vector<8x1024xf32>
    %c0_6 = arith.constant 0 : index
    %c0_7 = arith.constant 0 : index
    %6 = vector.load %arg4[%c0_6, %c0_7] : memref<8x1024xf32, #tpu.memory_space<vmem>>, vector<8x1024xf32>
    %7 = arith.addf %5, %6 : vector<8x1024xf32>
    %c0_8 = arith.constant 0 : index
    %c0_9 = arith.constant 0 : index
    %8 = vector.load %arg5[%c0_8, %c0_9] : memref<8x1024xf32, #tpu.memory_space<vmem>>, vector<8x1024xf32>
    tpu.vector_store %arg5[%c0_8, %c0_9], %7 {strides = array<i32>} : memref<8x1024xf32, #tpu.memory_space<vmem>>, vector<8x1024xf32>,
    return
  }
  func.func @transform_0(%arg0: i32) -> (i32, i32) {
    %c0_i32 = arith.constant 0 : i32
    %c0_i32_0 = arith.constant 0 : i32
    %c0_i32_1 = arith.constant 0 : i32
    return %c0_i32, %c0_i32_0 : i32, i32
  }
  func.func @transform_1(%arg0: i32) -> (i32, i32) {
    %c0_i32 = arith.constant 0 : i32
    %c0_i32_0 = arith.constant 0 : i32
    %c0_i32_1 = arith.constant 0 : i32
    return %c0_i32, %c0_i32_0 : i32, i32
  }
  func.func @transform_2(%arg0: i32) -> (i32, i32) {
    %c0_i32 = arith.constant 0 : i32
    %c0_i32_0 = arith.constant 0 : i32
    return %c0_i32, %arg0 : i32, i32
  }
  func.func @transform_3(%arg0: i32) -> (i32, i32) {
    %c0_i32 = arith.constant 0 : i32
    %c0_i32_0 = arith.constant 0 : i32
    return %c0_i32, %arg0 : i32, i32
  }
  func.func @transform_4(%arg0: i32) -> (i32, i32) {
    %c0_i32 = arith.constant 0 : i32
    %c0_i32_0 = arith.constant 0 : i32
    return %c0_i32, %arg0 : i32, i32
  }
}

</mosaic_0001>

<bundles_post_ra>
// kernel: tpu_custom_call.1
= control target key start
LH: loop header
LB: loop body
LE: loop exit
PB: predicated region body
PF: predicated region fallthrough
CT: control target
= control target key end

     0   :  { %9 = vsyncpa [#allocation3], 0  ;;  %s1420_s0 = inlined_call_operand.hbm [shape: f32[8,16], index: 0, kind: input, shape index: {}]   ;;  %s1421_s1 = inlined_call_operand.hbm [shape: f32[16,256], index: 1, kind: input, shape index: {}]   ;;  %s1422_s2 = inlined_call_operand.hbm [shape: bf16[256,1024], index: 2, kind: input, shape index: {}]   ;;  %s1423_s3 = inlined_call_operand.hbm [shape: f32[8,1024], index: 3, kind: input, shape index: {}]   ;;  %s1424_s4 = inlined_call_operand.hbm [shape: f32[8,1024], index: 4, kind: output, shape index: {}]  }
   0x1   :  { %10 = vsyncpa [#allocation6], 0 }
   0x2   :  { %11 = vsyncpa [#allocation9], 0 }
   0x3   :  { %12 = vsyncpa [#allocation4], 0  ;;  %s1363_s15 = smov [#allocation5]  }
   0x4   :  { %s28_s16 = sshll.u32 %s1363_s15, 4  ;;  %s29_s16 = int_to_ptr.vmem [resolvable:$true] %s28_s16 }
   0x5   :  { %s1263_s17 = scalar_lea.vmem %s29_s16, 512  ;;  %p1268_p1 = scmp.lt.s32.totalorder %s29_s16, %s29_s16 }
   0x6   :  { %p1264_p0 = scmp.ne.s32.totalorder %s29_s16, %s1263_s17  ;;  %p1269_p2 = scmp.lt.s32.totalorder %s1263_s17, %s1263_s17 }
   0x8   :  { %p1270_p3 = por %p1269_p2, %p1268_p1 }
   0xa   :  { %p1271_p4 = pnand %p1270_p3, %p1264_p0 }
   0xc   :  { %1274 = shalt.err (!%p1271_p4)
}
   0xd   :  { %s1364_s18 = smov 256   ;;  %s1365_s19 = smov 16  }
   0xe   :  { %34 = dma.hbm_to_vmem [thread:$0]  %s1421_s1, 512, %s29_s16, [#allocation6], %s1364_s18, %s1364_s18, %s1365_s19  }
   0xf   :  { %s1366_s22 = smov [#allocation2]   ;;  %s1367_s24 = smov [#allocation7]  }
  0x10   :  { %s19_s23 = sshll.u32 %s1366_s22, 4  ;;  %s40_s25 = sshll.u32 %s1367_s24, 4  ;;  %s20_s23 = int_to_ptr.vmem [resolvable:$true] %s19_s23  ;;  %s41_s25 = int_to_ptr.vmem [resolvable:$true] %s40_s25 }
  0x11   :  { %s1283_s26 = scalar_lea.vmem %s20_s23, 128  ;;  %p1288_p6 = scmp.lt.s32.totalorder %s20_s23, %s20_s23 }
  0x12   :  { %p1284_p5 = scmp.ne.s32.totalorder %s20_s23, %s1283_s26  ;;  %p1289_p7 = scmp.lt.s32.totalorder %s1283_s26, %s1283_s26 }
  0x14   :  { %p1290_p8 = por %p1289_p7, %p1288_p6 }
  0x16   :  { %p1291_p9 = pnand %p1290_p8, %p1284_p5 }
  0x18   :  { %1294 = shalt.err (!%p1291_p9)
}
  0x19   :  { %22 = dma.hbm_to_vmem [thread:$0]  %s1420_s0, 128, %s20_s23, [#allocation3]  }
  0x1a   :  { %s1303_s29 = scalar_lea.vmem %s41_s25, 16384  ;;  %p1308_p11 = scmp.lt.s32.totalorder %s41_s25, %s41_s25 }
  0x1b   :  { %p1304_p10 = scmp.ne.s32.totalorder %s41_s25, %s1303_s29  ;;  %p1309_p12 = scmp.lt.s32.totalorder %s1303_s29, %s1303_s29 }
  0x1d   :  { %p1310_p13 = por %p1309_p12, %p1308_p11 }
  0x1f   :  { %p1311_p0 = pnand %p1310_p13, %p1304_p10 }
  0x21   :  { %1314 = shalt.err (!%p1311_p0)
}
  0x22   :  { %s1368_s1 = smov 512   ;;  %s1369_s30 = smov 32  }
  0x23   :  { %46 = dma.hbm_to_vmem [thread:$0]  %s1422_s2, 16384, %s41_s25, [#allocation6], %s1368_s1, %s1368_s1, %s1369_s30  }
  0x24   :  { %s1370_s7 = smov [#allocation8]  }
  0x25   :  { %s53_s8 = sshll.u32 %s1370_s7, 4  ;;  %s54_s8 = int_to_ptr.vmem [resolvable:$true] %s53_s8 }
  0x26   :  { %s1323_s9 = scalar_lea.vmem %s54_s8, 1024  ;;  %p1328_p2 = scmp.lt.s32.totalorder %s54_s8, %s54_s8 }
  0x27   :  { %p1324_p1 = scmp.ne.s32.totalorder %s54_s8, %s1323_s9  ;;  %p1329_p3 = scmp.lt.s32.totalorder %s1323_s9, %s1323_s9 }
  0x29   :  { %p1330_p4 = por %p1329_p3, %p1328_p2 }
  0x2b   :  { %p1331_p5 = pnand %p1330_p4, %p1324_p1 }
  0x2d   :  { %1334 = shalt.err (!%p1331_p5)
}
  0x2e   :  { %56 = dma.hbm_to_vmem [thread:$0]  %s1423_s3, 1024, %s54_s8, [#allocation9]  }
  0x2f   :  { %1355 = dma.done.wait [#allocation3], 128  }
  0x30   :  { %1356 = vsyncadd [#allocation3], 4294967168 }
  0x31   :  { %1357 = dma.done.wait [#allocation6], 16896  }
  0x32   :  { %1358 = vsyncadd [#allocation6], 4294950400 }
  0x33   :  { %1359 = dma.done.wait [#allocation9], 1024  }
  0x34   :  { %1360 = vsyncadd [#allocation9], 4294966272  ;;  %v1371_v0 = vmov 0.0   ;;  %v73_v1 = vld [vmem:[#allocation5 + $0x18] sm:$0xff]  ;;  %v72_v2 = vld [vmem:[#allocation5 + $0x10] sm:$0xff]  ;;  %vm74_vm0 = vcmask 130048  }
  0x35   :  { %142 = vmatprep.mubr.f32.mxu0 %v1371_v0  ;;  %v71_v3 = vld [vmem:[#allocation5 + $0x8] sm:$0xff]  ;;  %106 = vmatprep.subr.mxu0 %v73_v1  ;;  %v70_v4 = vld [vmem:[#allocation5] sm:$0xff]  ;;  %v69_v5 = vld [vmem:[#allocation2] sm:$0xff]  ;;  %s1372_s2 = smov [#allocation10]  }
  0x36   :  { %v207_v6 = vld [vmem:[#allocation7 + $0x1c0] sm:$0xff]  ;;  %107 = vmatpush1.msra.mxu0 %v72_v2  ;;  %v208_v8 = vld [vmem:[#allocation7 + $0x1c8] sm:$0xff]  ;;  %s1105_s3 = sshll.u32 %s1372_s2, 4  ;;  %s1106_s3 = int_to_ptr.vmem [resolvable:$true] %s1105_s3 }
  0x37   :  { %v211_v7 = vld [vmem:[#allocation7 + $0x1e0] sm:$0xff]  ;;  %v212_v9 = vld [vmem:[#allocation7 + $0x1e8] sm:$0xff]  ;;  %108 = vmatprep.subr.mxu0 %v71_v3  ;;  %s1335_s11 = scalar_lea.vmem %s1106_s3, 1024  ;;  %p1340_p7 = scmp.lt.s32.totalorder %s1106_s3, %s1106_s3 }
  0x38   :  { %v1174_v10 = vcombine.high %v207_v6, %v211_v7  ;;  %v1175_v11 = vcombine.low %v208_v8, %v212_v9  ;;  %v1176_v12 = vcombine.high %v208_v8, %v212_v9  ;;  %v1173_v13 = vcombine.low %v207_v6, %v211_v7  ;;  %v199_v14 = vld [vmem:[#allocation7 + $0x180] sm:$0xff]  ;;  %v200_v16 = vld [vmem:[#allocation7 + $0x188] sm:$0xff]  ;;  %109 = vmatpush1.msra.mxu0 %v70_v4  ;;  %p1336_p6 = scmp.ne.s32.totalorder %s1106_s3, %s1335_s11  ;;  %p1341_p8 = scmp.lt.s32.totalorder %s1335_s11, %s1335_s11 }
  0x39   :  { %v203_v15 = vld [vmem:[#allocation7 + $0x1a0] sm:$0xff]  ;;  %v204_v18 = vld [vmem:[#allocation7 + $0x1a8] sm:$0xff]  ;;  %1116 = vmatmul.mubr.msk.f32.vlgmr.msra.gmra.mxu0 %vm74_vm0, %v69_v5 }
  0x3a   :  { %v1166_v17 = vcombine.high %v199_v14, %v203_v15  ;;  %v191_v19 = vld [vmem:[#allocation7 + $0x140] sm:$0xff]  ;;  %927 = vmatprep.subr.bf16.mxu1 %v1174_v10  ;;  %v1168_v21 = vcombine.high %v200_v16, %v204_v18  ;;  %v192_v22 = vld [vmem:[#allocation7 + $0x148] sm:$0xff]  ;;  %968 = vmatprep.subr.bf16.mxu0 %v1176_v12  ;;  %v1165_v24 = vcombine.low %v199_v14, %v203_v15  ;;  %p1342_p9 = por %p1341_p8, %p1340_p7 }
  0x3b   :  { %v195_v20 = vld [vmem:[#allocation7 + $0x160] sm:$0xff]  ;;  %v196_v23 = vld [vmem:[#allocation7 + $0x168] sm:$0xff]  ;;  %928 = vmatpush1.bf16.msra.mxu1 %v1173_v13  ;;  %969 = vmatpush1.bf16.msra.mxu0 %v1175_v11  ;;  %v1167_v25 = vcombine.low %v200_v16, %v204_v18 }
  0x3c   :  { %929 = vmatprep.subr.bf16.mxu1 %v1166_v17  ;;  %v1158_v26 = vcombine.high %v191_v19, %v195_v20  ;;  %970 = vmatprep.subr.bf16.mxu0 %v1168_v21  ;;  %v1160_v27 = vcombine.high %v192_v22, %v196_v23  ;;  %v183_v28 = vld [vmem:[#allocation7 + $0x100] sm:$0xff]  ;;  %v184_v30 = vld [vmem:[#allocation7 + $0x108] sm:$0xff]  ;;  %v1157_v32 = vcombine.low %v191_v19, %v195_v20  ;;  %p1343_p10 = pnand %p1342_p9, %p1336_p6 }
  0x3d   :  { %v187_v29 = vld [vmem:[#allocation7 + $0x120] sm:$0xff]  ;;  %v188_v31 = vld [vmem:[#allocation7 + $0x128] sm:$0xff]  ;;  %v1159_v33 = vcombine.low %v192_v22, %v196_v23 }
  0x3e   :  { %v1150_v34 = vcombine.high %v183_v28, %v187_v29  ;;  %v1152_v35 = vcombine.high %v184_v30, %v188_v31  ;;  %v175_v36 = vld [vmem:[#allocation7 + $0xc0] sm:$0xff]  ;;  %v176_v38 = vld [vmem:[#allocation7 + $0xc8] sm:$0xff]  ;;  %v1149_v40 = vcombine.low %v183_v28, %v187_v29  ;;  %v1151_v41 = vcombine.low %v184_v30, %v188_v31 }
  0x3f   :  { %930 = vmatpush1.bf16.msra.mxu1 %v1165_v24  ;;  %971 = vmatpush1.bf16.msra.mxu0 %v1167_v25  ;;  %v179_v37 = vld [vmem:[#allocation7 + $0xe0] sm:$0xff]  ;;  %v180_v39 = vld [vmem:[#allocation7 + $0xe8] sm:$0xff] }
  0x40   :  { %931 = vmatprep.subr.bf16.mxu1 %v1158_v26  ;;  %972 = vmatprep.subr.bf16.mxu0 %v1160_v27  ;;  %v1142_v42 = vcombine.high %v175_v36, %v179_v37  ;;  %v1144_v43 = vcombine.high %v176_v38, %v180_v39  ;;  %v167_v44 = vld [vmem:[#allocation7 + $0x80] sm:$0xff]  ;;  %v168_v46 = vld [vmem:[#allocation7 + $0x88] sm:$0xff]  ;;  %v1141_v48 = vcombine.low %v175_v36, %v179_v37 }
  0x41   :  { %v171_v45 = vld [vmem:[#allocation7 + $0xa0] sm:$0xff]  ;;  %v172_v47 = vld [vmem:[#allocation7 + $0xa8] sm:$0xff]  ;;  %v1143_v49 = vcombine.low %v176_v38, %v180_v39 }
  0x42   :  { %v1134_v50 = vcombine.high %v167_v44, %v171_v45  ;;  %v1136_v51 = vcombine.high %v168_v46, %v172_v47  ;;  %v159_v52 = vld [vmem:[#allocation7 + $0x40] sm:$0xff]  ;;  %v160_v54 = vld [vmem:[#allocation7 + $0x48] sm:$0xff]  ;;  %v1133_v56 = vcombine.low %v167_v44, %v171_v45  ;;  %v1135_v57 = vcombine.low %v168_v46, %v172_v47 }
  0x43   :  { %932 = vmatpush1.bf16.msra.mxu1 %v1157_v32  ;;  %973 = vmatpush1.bf16.msra.mxu0 %v1159_v33  ;;  %v163_v53 = vld [vmem:[#allocation7 + $0x60] sm:$0xff]  ;;  %v164_v55 = vld [vmem:[#allocation7 + $0x68] sm:$0xff] }
  0x44   :  { %933 = vmatprep.subr.bf16.mxu1 %v1150_v34  ;;  %974 = vmatprep.subr.bf16.mxu0 %v1152_v35  ;;  %v1126_v58 = vcombine.high %v159_v52, %v163_v53  ;;  %v1128_v59 = vcombine.high %v160_v54, %v164_v55  ;;  %v151_v60 = vld [vmem:[#allocation7] sm:$0xff]  ;;  %v152_v62 = vld [vmem:[#allocation7 + $0x8] sm:$0xff]  ;;  %v1125_v0 = vcombine.low %v159_v52, %v163_v53 }
  0x45   :  { %v155_v61 = vld [vmem:[#allocation7 + $0x20] sm:$0xff]  ;;  %v156_v63 = vld [vmem:[#allocation7 + $0x28] sm:$0xff]  ;;  %v1127_v1 = vcombine.low %v160_v54, %v164_v55 }
  0x46   :  { %v1118_v2 = vcombine.high %v151_v60, %v155_v61  ;;  %v1120_v3 = vcombine.high %v152_v62, %v156_v63  ;;  %v271_v4 = vld [vmem:[#allocation7 + $0x3c0] sm:$0xff]  ;;  %v272_v6 = vld [vmem:[#allocation7 + $0x3c8] sm:$0xff]  ;;  %v1117_v8 = vcombine.low %v151_v60, %v155_v61  ;;  %v1119_v9 = vcombine.low %v152_v62, %v156_v63 }
  0x47   :  { %934 = vmatpush1.bf16.msra.mxu1 %v1149_v40  ;;  %975 = vmatpush1.bf16.msra.mxu0 %v1151_v41  ;;  %v275_v5 = vld [vmem:[#allocation7 + $0x3e0] sm:$0xff]  ;;  %v276_v7 = vld [vmem:[#allocation7 + $0x3e8] sm:$0xff] }
  0x48   :  { %935 = vmatprep.subr.bf16.mxu1 %v1142_v42  ;;  %976 = vmatprep.subr.bf16.mxu0 %v1144_v43  ;;  %v1238_v10 = vcombine.high %v271_v4, %v275_v5  ;;  %v1240_v11 = vcombine.high %v272_v6, %v276_v7  ;;  %v263_v12 = vld [vmem:[#allocation7 + $0x380] sm:$0xff]  ;;  %v264_v14 = vld [vmem:[#allocation7 + $0x388] sm:$0xff]  ;;  %v1237_v16 = vcombine.low %v271_v4, %v275_v5 }
  0x49   :  { %v267_v13 = vld [vmem:[#allocation7 + $0x3a0] sm:$0xff]  ;;  %v268_v15 = vld [vmem:[#allocation7 + $0x3a8] sm:$0xff]  ;;  %v1239_v17 = vcombine.low %v272_v6, %v276_v7  ;;  %v209_v6 = vld [vmem:[#allocation7 + $0x1d0] sm:$0xff] }
  0x4a   :  { %v1230_v18 = vcombine.high %v263_v12, %v267_v13  ;;  %v1232_v19 = vcombine.high %v264_v14, %v268_v15  ;;  %v255_v20 = vld [vmem:[#allocation7 + $0x340] sm:$0xff]  ;;  %v256_v22 = vld [vmem:[#allocation7 + $0x348] sm:$0xff]  ;;  %v1229_v24 = vcombine.low %v263_v12, %v267_v13  ;;  %v1231_v25 = vcombine.low %v264_v14, %v268_v15  ;;  %v213_v7 = vld [vmem:[#allocation7 + $0x1f0] sm:$0xff] }
  0x4b   :  { %936 = vmatpush1.bf16.msra.mxu1 %v1141_v48  ;;  %977 = vmatpush1.bf16.msra.mxu0 %v1143_v49  ;;  %v259_v21 = vld [vmem:[#allocation7 + $0x360] sm:$0xff]  ;;  %v260_v23 = vld [vmem:[#allocation7 + $0x368] sm:$0xff]  ;;  %v201_v15 = vld [vmem:[#allocation7 + $0x190] sm:$0xff] }
  0x4c   :  { %937 = vmatprep.subr.bf16.mxu1 %v1134_v50  ;;  %978 = vmatprep.subr.bf16.mxu0 %v1136_v51  ;;  %v1222_v26 = vcombine.high %v255_v20, %v259_v21  ;;  %v1224_v27 = vcombine.high %v256_v22, %v260_v23  ;;  %v247_v28 = vld [vmem:[#allocation7 + $0x300] sm:$0xff]  ;;  %v248_v30 = vld [vmem:[#allocation7 + $0x308] sm:$0xff]  ;;  %v1221_v32 = vcombine.low %v255_v20, %v259_v21 }
  0x4d   :  { %v251_v29 = vld [vmem:[#allocation7 + $0x320] sm:$0xff]  ;;  %v252_v31 = vld [vmem:[#allocation7 + $0x328] sm:$0xff]  ;;  %v1223_v33 = vcombine.low %v256_v22, %v260_v23  ;;  %v193_v22 = vld [vmem:[#allocation7 + $0x150] sm:$0xff] }
  0x4e   :  { %v1214_v34 = vcombine.high %v247_v28, %v251_v29  ;;  %v1216_v35 = vcombine.high %v248_v30, %v252_v31  ;;  %v239_v36 = vld [vmem:[#allocation7 + $0x2c0] sm:$0xff]  ;;  %v240_v38 = vld [vmem:[#allocation7 + $0x2c8] sm:$0xff]  ;;  %v1213_v40 = vcombine.low %v247_v28, %v251_v29  ;;  %v1215_v41 = vcombine.low %v248_v30, %v252_v31 }
  0x4f   :  { %938 = vmatpush1.bf16.msra.mxu1 %v1133_v56  ;;  %979 = vmatpush1.bf16.msra.mxu0 %v1135_v57  ;;  %v243_v37 = vld [vmem:[#allocation7 + $0x2e0] sm:$0xff]  ;;  %v244_v39 = vld [vmem:[#allocation7 + $0x2e8] sm:$0xff] }
  0x50   :  { %939 = vmatprep.subr.bf16.mxu1 %v1126_v58  ;;  %980 = vmatprep.subr.bf16.mxu0 %v1128_v59  ;;  %v1206_v42 = vcombine.high %v239_v36, %v243_v37  ;;  %v1208_v43 = vcombine.high %v240_v38, %v244_v39  ;;  %v231_v44 = vld [vmem:[#allocation7 + $0x280] sm:$0xff]  ;;  %v232_v46 = vld [vmem:[#allocation7 + $0x288] sm:$0xff]  ;;  %v1205_v48 = vcombine.low %v239_v36, %v243_v37 }
  0x51   :  { %v235_v45 = vld [vmem:[#allocation7 + $0x2a0] sm:$0xff]  ;;  %v236_v47 = vld [vmem:[#allocation7 + $0x2a8] sm:$0xff]  ;;  %v1207_v49 = vcombine.low %v240_v38, %v244_v39 }
  0x52   :  { %v1198_v50 = vcombine.high %v231_v44, %v235_v45  ;;  %v1200_v51 = vcombine.high %v232_v46, %v236_v47  ;;  %v223_v52 = vld [vmem:[#allocation7 + $0x240] sm:$0xff]  ;;  %v224_v54 = vld [vmem:[#allocation7 + $0x248] sm:$0xff]  ;;  %v1197_v56 = vcombine.low %v231_v44, %v235_v45  ;;  %v1199_v57 = vcombine.low %v232_v46, %v236_v47 }
  0x53   :  { %940 = vmatpush1.bf16.msra.mxu1 %v1125_v0  ;;  %981 = vmatpush1.bf16.msra.mxu0 %v1127_v1  ;;  %v227_v53 = vld [vmem:[#allocation7 + $0x260] sm:$0xff]  ;;  %v228_v55 = vld [vmem:[#allocation7 + $0x268] sm:$0xff] }
  0x54   :  { %941 = vmatprep.subr.bf16.mxu1 %v1118_v2  ;;  %982 = vmatprep.subr.bf16.mxu0 %v1120_v3  ;;  %v1190_v58 = vcombine.high %v223_v52, %v227_v53  ;;  %v1192_v59 = vcombine.high %v224_v54, %v228_v55  ;;  %v1189_v60 = vcombine.low %v223_v52, %v227_v53  ;;  %v215_v62 = vld [vmem:[#allocation7 + $0x200] sm:$0xff]  ;;  %v216_v0 = vld [vmem:[#allocation7 + $0x208] sm:$0xff] }
  0x55   :  { %v1191_v61 = vcombine.low %v224_v54, %v228_v55  ;;  %v219_v63 = vld [vmem:[#allocation7 + $0x220] sm:$0xff]  ;;  %v220_v2 = vld [vmem:[#allocation7 + $0x228] sm:$0xff] }
  0x56   :  { %v1182_v1 = vcombine.high %v215_v62, %v219_v63  ;;  %v1183_v3 = vcombine.low %v216_v0, %v220_v2  ;;  %v1184_v4 = vcombine.high %v216_v0, %v220_v2  ;;  %v1181_v5 = vcombine.low %v215_v62, %v219_v63  ;;  %v153_v0 = vld [vmem:[#allocation7 + $0x10] sm:$0xff]  ;;  %v154_v2 = vld [vmem:[#allocation7 + $0x18] sm:$0xff] }
  0x57   :  { %942 = vmatpush1.bf16.msra.mxu1 %v1117_v8  ;;  %983 = vmatpush1.bf16.msra.mxu0 %v1119_v9  ;;  %v210_v8 = vld [vmem:[#allocation7 + $0x1d8] sm:$0xff]  ;;  %v1178_v9 = vcombine.high %v209_v6, %v213_v7 }
  0x58   :  { %943 = vmatprep.subr.bf16.mxu1 %v1238_v10  ;;  %984 = vmatprep.subr.bf16.mxu0 %v1240_v11  ;;  %v214_v10 = vld [vmem:[#allocation7 + $0x1f8] sm:$0xff]  ;;  %v1177_v11 = vcombine.low %v209_v6, %v213_v7 }
  0x59   :  { %v1179_v12 = vcombine.low %v210_v8, %v214_v10  ;;  %v1180_v13 = vcombine.high %v210_v8, %v214_v10  ;;  %v273_v8 = vld [vmem:[#allocation7 + $0x3d0] sm:$0xff]  ;;  %v274_v10 = vld [vmem:[#allocation7 + $0x3d8] sm:$0xff] }
  0x5b   :  { %944 = vmatpush2.bf16.msra.mxu1 %v1237_v16  ;;  %985 = vmatpush2.bf16.msra.mxu0 %v1239_v17  ;;  %v205_v17 = vld [vmem:[#allocation7 + $0x1b0] sm:$0xff] }
  0x5c   :  { %945 = vmatprep.subr.bf16.mxu1 %v1230_v18  ;;  %986 = vmatprep.subr.bf16.mxu0 %v1232_v19  ;;  %v202_v18 = vld [vmem:[#allocation7 + $0x198] sm:$0xff]  ;;  %v1170_v23 = vcombine.high %v201_v15, %v205_v17  ;;  %v1169_v28 = vcombine.low %v201_v15, %v205_v17  ;;  %v269_v17 = vld [vmem:[#allocation7 + $0x3b0] sm:$0xff] }
  0x5d   :  { %v206_v19 = vld [vmem:[#allocation7 + $0x1b8] sm:$0xff] }
  0x5e   :  { %v1171_v29 = vcombine.low %v202_v18, %v206_v19 }
  0x5f   :  { %946 = vmatpush2.bf16.msra.mxu1 %v1229_v24  ;;  %987 = vmatpush2.bf16.msra.mxu0 %v1231_v25  ;;  %v1172_v24 = vcombine.high %v202_v18, %v206_v19  ;;  %v197_v25 = vld [vmem:[#allocation7 + $0x170] sm:$0xff]  ;;  %v266_v18 = vld [vmem:[#allocation7 + $0x398] sm:$0xff] }
  0x60   :  { %947 = vmatprep.subr.bf16.mxu1 %v1222_v26  ;;  %988 = vmatprep.subr.bf16.mxu0 %v1224_v27  ;;  %v194_v26 = vld [vmem:[#allocation7 + $0x158] sm:$0xff]  ;;  %v1162_v30 = vcombine.high %v193_v22, %v197_v25  ;;  %v1161_v36 = vcombine.low %v193_v22, %v197_v25  ;;  %v257_v25 = vld [vmem:[#allocation7 + $0x350] sm:$0xff] }
  0x61   :  { %v198_v27 = vld [vmem:[#allocation7 + $0x178] sm:$0xff] }
  0x62   :  { %v1164_v31 = vcombine.high %v194_v26, %v198_v27  ;;  %v1163_v37 = vcombine.low %v194_v26, %v198_v27  ;;  %v270_v19 = vld [vmem:[#allocation7 + $0x3b8] sm:$0xff]  ;;  %v261_v26 = vld [vmem:[#allocation7 + $0x370] sm:$0xff] }
  0x63   :  { %948 = vmatpush2.bf16.msra.mxu1 %v1221_v32  ;;  %989 = vmatpush2.bf16.msra.mxu0 %v1223_v33  ;;  %v185_v32 = vld [vmem:[#allocation7 + $0x110] sm:$0xff]  ;;  %v258_v27 = vld [vmem:[#allocation7 + $0x358] sm:$0xff] }
  0x64   :  { %949 = vmatprep.subr.bf16.mxu1 %v1214_v34  ;;  %990 = vmatprep.subr.bf16.mxu0 %v1216_v35  ;;  %v189_v33 = vld [vmem:[#allocation7 + $0x130] sm:$0xff]  ;;  %v186_v34 = vld [vmem:[#allocation7 + $0x118] sm:$0xff] }
  0x65   :  { %v190_v35 = vld [vmem:[#allocation7 + $0x138] sm:$0xff]  ;;  %v1154_v38 = vcombine.high %v185_v32, %v189_v33  ;;  %v1153_v44 = vcombine.low %v185_v32, %v189_v33  ;;  %v249_v33 = vld [vmem:[#allocation7 + $0x310] sm:$0xff] }
  0x66   :  { %v1156_v39 = vcombine.high %v186_v34, %v190_v35  ;;  %v1155_v45 = vcombine.low %v186_v34, %v190_v35  ;;  %v253_v34 = vld [vmem:[#allocation7 + $0x330] sm:$0xff]  ;;  %v250_v35 = vld [vmem:[#allocation7 + $0x318] sm:$0xff] }
  0x67   :  { %950 = vmatpush2.bf16.msra.mxu1 %v1213_v40  ;;  %991 = vmatpush2.bf16.msra.mxu0 %v1215_v41  ;;  %v177_v40 = vld [vmem:[#allocation7 + $0xd0] sm:$0xff] }
  0x68   :  { %951 = vmatprep.subr.bf16.mxu1 %v1206_v42  ;;  %992 = vmatprep.subr.bf16.mxu0 %v1208_v43  ;;  %v181_v41 = vld [vmem:[#allocation7 + $0xf0] sm:$0xff]  ;;  %v178_v42 = vld [vmem:[#allocation7 + $0xd8] sm:$0xff] }
  0x69   :  { %v182_v43 = vld [vmem:[#allocation7 + $0xf8] sm:$0xff]  ;;  %v1146_v46 = vcombine.high %v177_v40, %v181_v41  ;;  %v1145_v52 = vcombine.low %v177_v40, %v181_v41  ;;  %v241_v41 = vld [vmem:[#allocation7 + $0x2d0] sm:$0xff] }
  0x6a   :  { %v1148_v47 = vcombine.high %v178_v42, %v182_v43  ;;  %v1147_v53 = vcombine.low %v178_v42, %v182_v43  ;;  %v245_v42 = vld [vmem:[#allocation7 + $0x2f0] sm:$0xff]  ;;  %v242_v43 = vld [vmem:[#allocation7 + $0x2d8] sm:$0xff] }
  0x6b   :  { %952 = vmatpush2.bf16.msra.mxu1 %v1205_v48  ;;  %993 = vmatpush2.bf16.msra.mxu0 %v1207_v49  ;;  %v169_v48 = vld [vmem:[#allocation7 + $0x90] sm:$0xff] }
  0x6c   :  { %953 = vmatprep.subr.bf16.mxu1 %v1198_v50  ;;  %994 = vmatprep.subr.bf16.mxu0 %v1200_v51  ;;  %v173_v49 = vld [vmem:[#allocation7 + $0xb0] sm:$0xff]  ;;  %v170_v50 = vld [vmem:[#allocation7 + $0x98] sm:$0xff] }
  0x6d   :  { %v174_v51 = vld [vmem:[#allocation7 + $0xb8] sm:$0xff]  ;;  %v1138_v54 = vcombine.high %v169_v48, %v173_v49 }
  0x6e   :  { %v1140_v55 = vcombine.high %v170_v50, %v174_v51 }
  0x6f   :  { %954 = vmatpush2.bf16.msra.mxu1 %v1197_v56  ;;  %995 = vmatpush2.bf16.msra.mxu0 %v1199_v57  ;;  %v161_v56 = vld [vmem:[#allocation7 + $0x50] sm:$0xff] }
  0x70   :  { %955 = vmatprep.subr.bf16.mxu1 %v1190_v58  ;;  %996 = vmatprep.subr.bf16.mxu0 %v1192_v59  ;;  %v165_v57 = vld [vmem:[#allocation7 + $0x70] sm:$0xff]  ;;  %v162_v58 = vld [vmem:[#allocation7 + $0x58] sm:$0xff] }
  0x71   :  { %v166_v59 = vld [vmem:[#allocation7 + $0x78] sm:$0xff]  ;;  %v1130_v62 = vcombine.high %v161_v56, %v165_v57 }
  0x72   :  { %v1132_v63 = vcombine.high %v162_v58, %v166_v59 }
  0x73   :  { %956 = vmatpush2.bf16.msra.mxu1 %v1189_v60  ;;  %997 = vmatpush2.bf16.msra.mxu0 %v1191_v61  ;;  %v1137_v60 = vcombine.low %v169_v48, %v173_v49  ;;  %v1139_v61 = vcombine.low %v170_v50, %v174_v51  ;;  %v233_v49 = vld [vmem:[#allocation7 + $0x290] sm:$0xff]  ;;  %v234_v51 = vld [vmem:[#allocation7 + $0x298] sm:$0xff] }
  0x74   :  { %957 = vmatprep.subr.bf16.mxu1 %v1182_v1  ;;  %998 = vmatprep.subr.bf16.mxu0 %v1184_v4  ;;  %v157_v1 = vld [vmem:[#allocation7 + $0x30] sm:$0xff]  ;;  %v1129_v4 = vcombine.low %v161_v56, %v165_v57 }
  0x75   :  { %v1122_v6 = vcombine.high %v153_v0, %v157_v1  ;;  %v237_v50 = vld [vmem:[#allocation7 + $0x2b0] sm:$0xff] }
  0x76   :  { %v225_v57 = vld [vmem:[#allocation7 + $0x250] sm:$0xff] }
  0x77   :  { %958 = vmatpush2.bf16.msra.mxu1 %v1181_v5  ;;  %999 = vmatpush2.bf16.msra.mxu0 %v1183_v3  ;;  %v158_v3 = vld [vmem:[#allocation7 + $0x38] sm:$0xff]  ;;  %v1131_v5 = vcombine.low %v162_v58, %v166_v59  ;;  %v229_v58 = vld [vmem:[#allocation7 + $0x270] sm:$0xff] }
  0x78   :  { %1009 = vmatprep.subr.bf16.mxu1 %v1178_v9  ;;  %1050 = vmatprep.subr.bf16.mxu0 %v1180_v13  ;;  %v1124_v7 = vcombine.high %v154_v2, %v158_v3  ;;  %v277_v9 = vld [vmem:[#allocation7 + $0x3f0] sm:$0xff]  ;;  %v1123_v13 = vcombine.low %v154_v2, %v158_v3  ;;  %v226_v59 = vld [vmem:[#allocation7 + $0x258] sm:$0xff] }
  0x79   :  { %v221_v2 = vld [vmem:[#allocation7 + $0x230] sm:$0xff]  ;;  %v218_v3 = vld [vmem:[#allocation7 + $0x218] sm:$0xff] }
  0xf9   :  { %v144_v14 = vpop.f32.mrf.mxu0 }
  0xfa   :  { %v1411_v21 = vpack.c.bf16 %v144_v14, %v144_v14  ;;  %v1242_v14 = vcombine.high %v273_v8, %v277_v9 }
  0xfb   :  { %v146_v16 = vpop.f32.mrf.mxu0 }
  0xfc   :  { %v150_v20 = vpack.c.bf16 %v146_v16, %v146_v16  ;;  %v265_v16 = vld [vmem:[#allocation7 + $0x390] sm:$0xff] }
  0xfe   :  { %959 = vmatprep.mubr.bf16.mxu1 %v150_v20  ;;  %1000 = vmatprep.mubr.bf16.mxu0 %v150_v20 }
  0xff   :  { %960 = vmatmul.mubr.bf16.vlgmr.msra.gmra.mxu1 %v1411_v21  ;;  %1001 = vmatmul.mubr.bf16.vlgmr.msra.gmra.mxu0 %v1411_v21 }
 0x100   :  { %1010 = vmatpush1.bf16.msra.mxu1 %v1177_v11  ;;  %1051 = vmatpush1.bf16.msra.mxu0 %v1179_v12  ;;  %v278_v11 = vld [vmem:[#allocation7 + $0x3f8] sm:$0xff]  ;;  %v1121_v12 = vcombine.low %v153_v0, %v157_v1  ;;  %v217_v1 = vld [vmem:[#allocation7 + $0x210] sm:$0xff] }
 0x101   :  { %1041 = vmatprep.mubr.bf16.mxu1 %v150_v20  ;;  %1082 = vmatprep.mubr.bf16.mxu0 %v150_v20  ;;  %v1244_v15 = vcombine.high %v274_v10, %v278_v11  ;;  %v1241_v20 = vcombine.low %v273_v8, %v277_v9  ;;  %v1243_v22 = vcombine.low %v274_v10, %v278_v11  ;;  %v279_v11 = vld [vmem:[#allocation8] sm:$0xff] }
 0x102   :  { %1011 = vmatprep.subr.bf16.mxu1 %v1170_v23  ;;  %1052 = vmatprep.subr.bf16.mxu0 %v1172_v24  ;;  %v1234_v23 = vcombine.high %v265_v16, %v269_v17  ;;  %v1236_v24 = vcombine.high %v266_v18, %v270_v19  ;;  %v1185_v9 = vcombine.low %v217_v1, %v221_v2 }
 0x104   :  { %1012 = vmatpush1.bf16.msra.mxu1 %v1169_v28  ;;  %1053 = vmatpush1.bf16.msra.mxu0 %v1171_v29  ;;  %v262_v28 = vld [vmem:[#allocation7 + $0x378] sm:$0xff]  ;;  %v1233_v29 = vcombine.low %v265_v16, %v269_v17 }
 0x105   :  { %1013 = vmatprep.subr.bf16.mxu1 %v1162_v30  ;;  %1054 = vmatprep.subr.bf16.mxu0 %v1164_v31  ;;  %v1235_v30 = vcombine.low %v266_v18, %v270_v19  ;;  %v1226_v31 = vcombine.high %v257_v25, %v261_v26  ;;  %v1228_v32 = vcombine.high %v258_v27, %v262_v28  ;;  %v282_v16 = vld [vmem:[#allocation8 + $0x18] sm:$0xff] }
 0x108   :  { %1014 = vmatpush1.bf16.msra.mxu1 %v1161_v36  ;;  %1055 = vmatpush1.bf16.msra.mxu0 %v1163_v37  ;;  %v254_v36 = vld [vmem:[#allocation7 + $0x338] sm:$0xff]  ;;  %v1225_v37 = vcombine.low %v257_v25, %v261_v26 }
 0x109   :  { %1015 = vmatprep.subr.bf16.mxu1 %v1154_v38  ;;  %1056 = vmatprep.subr.bf16.mxu0 %v1156_v39  ;;  %v1227_v38 = vcombine.low %v258_v27, %v262_v28  ;;  %v1218_v39 = vcombine.high %v249_v33, %v253_v34  ;;  %v1220_v40 = vcombine.high %v250_v35, %v254_v36  ;;  %v283_v27 = vld [vmem:[#allocation8 + $0x20] sm:$0xff]  ;;  %v285_v28 = vld [vmem:[#allocation8 + $0x30] sm:$0xff] }
 0x10c   :  { %1016 = vmatpush1.bf16.msra.mxu1 %v1153_v44  ;;  %1057 = vmatpush1.bf16.msra.mxu0 %v1155_v45  ;;  %v246_v44 = vld [vmem:[#allocation7 + $0x2f8] sm:$0xff]  ;;  %v1217_v45 = vcombine.low %v249_v33, %v253_v34 }
 0x10d   :  { %1017 = vmatprep.subr.bf16.mxu1 %v1146_v46  ;;  %1058 = vmatprep.subr.bf16.mxu0 %v1148_v47  ;;  %v1219_v46 = vcombine.low %v250_v35, %v254_v36  ;;  %v1210_v47 = vcombine.high %v241_v41, %v245_v42  ;;  %v1212_v48 = vcombine.high %v242_v43, %v246_v44 }
 0x110   :  { %1018 = vmatpush1.bf16.msra.mxu1 %v1145_v52  ;;  %1059 = vmatpush1.bf16.msra.mxu0 %v1147_v53  ;;  %v238_v52 = vld [vmem:[#allocation7 + $0x2b8] sm:$0xff]  ;;  %v1209_v53 = vcombine.low %v241_v41, %v245_v42 }
 0x111   :  { %1019 = vmatprep.subr.bf16.mxu1 %v1138_v54  ;;  %1060 = vmatprep.subr.bf16.mxu0 %v1140_v55  ;;  %v1211_v54 = vcombine.low %v242_v43, %v246_v44  ;;  %v1202_v55 = vcombine.high %v233_v49, %v237_v50  ;;  %v1204_v56 = vcombine.high %v234_v51, %v238_v52 }
 0x114   :  { %1020 = vmatpush1.bf16.msra.mxu1 %v1137_v60  ;;  %1061 = vmatpush1.bf16.msra.mxu0 %v1139_v61  ;;  %v230_v60 = vld [vmem:[#allocation7 + $0x278] sm:$0xff]  ;;  %v1201_v61 = vcombine.low %v233_v49, %v237_v50 }
 0x115   :  { %1021 = vmatprep.subr.bf16.mxu1 %v1130_v62  ;;  %1062 = vmatprep.subr.bf16.mxu0 %v1132_v63  ;;  %v1203_v62 = vcombine.low %v234_v51, %v238_v52  ;;  %v1194_v63 = vcombine.high %v225_v57, %v229_v58  ;;  %v1196_v0 = vcombine.high %v226_v59, %v230_v60 }
 0x118   :  { %1022 = vmatpush1.bf16.msra.mxu1 %v1129_v4  ;;  %1063 = vmatpush1.bf16.msra.mxu0 %v1131_v5  ;;  %v222_v4 = vld [vmem:[#allocation7 + $0x238] sm:$0xff]  ;;  %v1193_v5 = vcombine.low %v225_v57, %v229_v58 }
 0x119   :  { %1023 = vmatprep.subr.bf16.mxu1 %v1122_v6  ;;  %1064 = vmatprep.subr.bf16.mxu0 %v1124_v7  ;;  %v1195_v6 = vcombine.low %v226_v59, %v230_v60  ;;  %v1186_v7 = vcombine.high %v217_v1, %v221_v2  ;;  %v1188_v8 = vcombine.high %v218_v3, %v222_v4 }
 0x11a   :  { %v1187_v10 = vcombine.low %v218_v3, %v222_v4 }
 0x11c   :  { %1024 = vmatpush1.bf16.msra.mxu1 %v1121_v12  ;;  %1065 = vmatpush1.bf16.msra.mxu0 %v1123_v13  ;;  %v281_v12 = vld [vmem:[#allocation8 + $0x10] sm:$0xff] }
 0x11d   :  { %1025 = vmatprep.subr.bf16.mxu1 %v1242_v14  ;;  %1066 = vmatprep.subr.bf16.mxu0 %v1244_v15  ;;  %v280_v15 = vld [vmem:[#allocation8 + $0x8] sm:$0xff] }
 0x120   :  { %1026 = vmatpush2.bf16.msra.mxu1 %v1241_v20  ;;  %1067 = vmatpush2.bf16.msra.mxu0 %v1243_v22 }
 0x121   :  { %1027 = vmatprep.subr.bf16.mxu1 %v1234_v23  ;;  %1068 = vmatprep.subr.bf16.mxu0 %v1236_v24 }
 0x124   :  { %1028 = vmatpush2.bf16.msra.mxu1 %v1233_v29  ;;  %1069 = vmatpush2.bf16.msra.mxu0 %v1235_v30 }
 0x125   :  { %1029 = vmatprep.subr.bf16.mxu1 %v1226_v31  ;;  %1070 = vmatprep.subr.bf16.mxu0 %v1228_v32  ;;  %v284_v31 = vld [vmem:[#allocation8 + $0x28] sm:$0xff]  ;;  %v286_v32 = vld [vmem:[#allocation8 + $0x38] sm:$0xff] }
 0x128   :  { %1030 = vmatpush2.bf16.msra.mxu1 %v1225_v37  ;;  %1071 = vmatpush2.bf16.msra.mxu0 %v1227_v38 }
 0x129   :  { %1031 = vmatprep.subr.bf16.mxu1 %v1218_v39  ;;  %1072 = vmatprep.subr.bf16.mxu0 %v1220_v40 }
 0x12c   :  { %1032 = vmatpush2.bf16.msra.mxu1 %v1217_v45  ;;  %1073 = vmatpush2.bf16.msra.mxu0 %v1219_v46 }
 0x12d   :  { %1033 = vmatprep.subr.bf16.mxu1 %v1210_v47  ;;  %1074 = vmatprep.subr.bf16.mxu0 %v1212_v48 }
 0x130   :  { %1034 = vmatpush2.bf16.msra.mxu1 %v1209_v53  ;;  %1075 = vmatpush2.bf16.msra.mxu0 %v1211_v54 }
 0x131   :  { %1035 = vmatprep.subr.bf16.mxu1 %v1202_v55  ;;  %1076 = vmatprep.subr.bf16.mxu0 %v1204_v56 }
 0x134   :  { %1036 = vmatpush2.bf16.msra.mxu1 %v1201_v61  ;;  %1077 = vmatpush2.bf16.msra.mxu0 %v1203_v62 }
 0x135   :  { %1037 = vmatprep.subr.bf16.mxu1 %v1194_v63  ;;  %1078 = vmatprep.subr.bf16.mxu0 %v1196_v0 }
 0x138   :  { %1038 = vmatpush2.bf16.msra.mxu1 %v1193_v5  ;;  %1079 = vmatpush2.bf16.msra.mxu0 %v1195_v6 }
 0x139   :  { %1039 = vmatprep.subr.bf16.mxu1 %v1186_v7  ;;  %1080 = vmatprep.subr.bf16.mxu0 %v1188_v8 }
 0x13c   :  { %1040 = vmatpush2.bf16.msra.mxu1 %v1185_v9  ;;  %1081 = vmatpush2.bf16.msra.mxu0 %v1187_v10 }
 0x13f   :  { %1042 = vmatmul.mubr.bf16.vlgmr.msra.gmra.mxu1 %v1411_v21  ;;  %1083 = vmatmul.mubr.bf16.vlgmr.msra.gmra.mxu0 %v1411_v21 }
 0x1bf   :  { %v961_v13 = vpop.f32.mrf.mxu1  ;;  %v1002_v14 = vpop.f32.mrf.mxu0 }
 0x1c0   :  { %v962_v17 = vadd.f32 %v961_v13, %v279_v11  ;;  %v1003_v18 = vadd.f32 %v1002_v14, %v281_v12 }
 0x1c1   :  { %v963_v19 = vpop.f32.mrf.mxu1  ;;  %v1004_v20 = vpop.f32.mrf.mxu0 }
 0x1c2   :  { %1091 = vst [vmem:[#allocation10] sm:$0xff] %v962_v17  ;;  %1093 = vst [vmem:[#allocation10 + $0x10] sm:$0xff] %v1003_v18  ;;  %v964_v22 = vadd.f32 %v963_v19, %v280_v15  ;;  %v1005_v23 = vadd.f32 %v1004_v20, %v282_v16 }
 0x1c3   :  { %v965_v24 = vpop.f32.mrf.mxu1  ;;  %v1006_v25 = vpop.f32.mrf.mxu0 }
 0x1c4   :  { %1092 = vst [vmem:[#allocation10 + $0x8] sm:$0xff] %v964_v22  ;;  %1094 = vst [vmem:[#allocation10 + $0x18] sm:$0xff] %v1005_v23 }
 0x1c5   :  { %v966_v26 = vpop.f32.mrf.mxu1  ;;  %v1007_v21 = vpop.f32.mrf.mxu0 }
 0x1ff   :  { %v1043_v29 = vpop.f32.mrf.mxu1  ;;  %v1084_v30 = vpop.f32.mrf.mxu0 }
 0x200   :  { %v1044_v33 = vadd.f32 %v1043_v29, %v283_v27  ;;  %v1085_v34 = vadd.f32 %v1084_v30, %v285_v28 }
 0x201   :  { %v1045_v35 = vpop.f32.mrf.mxu1  ;;  %v1086_v36 = vpop.f32.mrf.mxu0 }
 0x202   :  { %1095 = vst [vmem:[#allocation10 + $0x20] sm:$0xff] %v1044_v33  ;;  %1097 = vst [vmem:[#allocation10 + $0x30] sm:$0xff] %v1085_v34  ;;  %v1046_v37 = vadd.f32 %v1045_v35, %v284_v31  ;;  %v1087_v38 = vadd.f32 %v1086_v36, %v286_v32 }
 0x203   :  { %v1047_v39 = vpop.f32.mrf.mxu1  ;;  %v1088_v40 = vpop.f32.mrf.mxu0 }
 0x204   :  { %1096 = vst [vmem:[#allocation10 + $0x28] sm:$0xff] %v1046_v37  ;;  %1098 = vst [vmem:[#allocation10 + $0x38] sm:$0xff] %v1087_v38 }
 0x205   :  { %v1048_v41 = vpop.f32.mrf.mxu1  ;;  %v1089_v42 = vpop.f32.mrf.mxu0 }
 0x206   :  { %1346 = shalt.err (!%p1343_p10)
}
 0x207   :  { %1108 = dma.vmem_to_hbm [thread:$0]  %s1106_s3, 1024, %s1424_s4, [#allocation4]  }
 0x208   :  { %1361 = dma.done.wait [#allocation4], 1024  }
 0x209   :  { %1362 = vsyncadd [#allocation4], 4294966272 }
 0x20a   :  { %1112 = vsyncpa [#allocation3], 1 }
 0x20b   :  { %1113 = vsyncpa [#allocation6], 1 }
 0x20c   :  { %1114 = vsyncpa [#allocation9], 1 }
 0x20d   :  { %1115 = vsyncpa [#allocation4], 1 }

</bundles_post_ra>
